<compile_context>
chip_gen: v7x
topology: tpu7x:2x2x1
jax: 0.10.0
libtpu: 0.0.40
codegen_flags: <defaults>
</compile_context>

<pallas_src>
import functools

import numpy as np
import jax
import jax.numpy as jnp
from jax.experimental import pallas as pl
from jax.experimental.pallas import tpu as pltpu

NEG_SLOPE = 0.01   # torch.nn.LeakyReLU default
PAD = 128          # lane width: every feature (output) dim is zero-padded to this


def _lrelu(v):
    return jnp.where(v > 0, v, NEG_SLOPE * v)


def _round_up(v, m):
    return (v + m - 1) // m * m


def _inv_mlp_embedding_kernel(x_ref, ids_col_ref, ids_row_ref, w_ref, b_ref,
                              out_ref, *, n_seg, kr):
    f32 = jnp.float32
    bf16 = jnp.bfloat16

    x = x_ref[...]                      # (Np, kr) bf16  zero-padded node features
    b = b_ref[...]                      # (8, PAD) f32   rows 0..5 = b1..b6 (lane-padded)

    def wblk(i):
        # (kr, PAD) bf16 block of the packed weight slab; rows beyond the real
        # fan_in and lanes beyond the real fan_out are zero.
        return w_ref[pl.ds(i * kr, kr), :]

    def kslice(a):
        # first kr lanes of an f32 activation, cast to bf16 for the MXU
        return a[:, :kr].astype(bf16)

    # ---- pre-embedding MLP ---------------------------------------------------
    h = _lrelu(jnp.dot(x, wblk(0), preferred_element_type=f32) + b[0:1, :])
    h = _lrelu(jnp.dot(kslice(h), wblk(1), preferred_element_type=f32) + b[1:2, :])
    e = jnp.dot(kslice(h), wblk(2), preferred_element_type=f32) + b[2:3, :]      # (Np, PAD)
    e_k = kslice(e)                                                              # (Np, kr)

    # ---- scatter(mean) over aisle ids via one-hot matmuls (no transposes) ----
    # Two one-hot orientations are built directly from the two id layouts so both
    # matmuls are standard orientation (contract lhs dim 1 with rhs dim 0).
    n = x.shape[0]
    ids_col = ids_col_ref[...]                                                   # (Np, 1) int32
    ids_row = ids_row_ref[...]                                                   # (1, Np) int32
    oh_ns = (jax.lax.broadcasted_iota(jnp.int32, (n, n_seg), 1) == ids_col
             ).astype(f32)                                                       # (Np, S)
    oh_sn = (jax.lax.broadcasted_iota(jnp.int32, (n_seg, n), 0) == ids_row
             ).astype(f32).astype(bf16)                                          # (S, Np)

    counts = jnp.sum(oh_ns, axis=0, keepdims=True)                               # (1, S)
    inv = 1.0 / jnp.maximum(counts, 1.0)                                         # exact f32 divide
    seg_sum = jnp.dot(oh_sn, e_k, preferred_element_type=f32)                    # (S, kr)
    # gathered[i] = seg_mean[ids[i]] == (onehot * 1/count) @ seg_sum
    gathered = jnp.dot((oh_ns * inv).astype(bf16), seg_sum.astype(bf16),
                       preferred_element_type=f32)                               # (Np, kr)

    # ---- concat-free post-embedding MLP (last layer has NO activation) -------
    h2 = _lrelu(jnp.dot(e_k, wblk(3), preferred_element_type=f32)
                + jnp.dot(gathered.astype(bf16), wblk(4), preferred_element_type=f32)
                + b[3:4, :])
    h2 = _lrelu(jnp.dot(kslice(h2), wblk(5), preferred_element_type=f32) + b[4:5, :])
    out_ref[...] = jnp.dot(kslice(h2), wblk(6), preferred_element_type=f32) + b[5:6, :]


def _pack_params(params, kr):
    """Row-pad each weight to kr rows (NOT 128), lane-pad to PAD, pack, cast bf16."""
    emb = params["w3"].shape[1]

    def padw(w):
        fi, fo = w.shape
        assert fi <= kr and fo <= PAD
        return jnp.zeros((kr, PAD), jnp.float32).at[:fi, :fo].set(
            jnp.asarray(w, jnp.float32))

    def padb(bv):
        bv = jnp.reshape(jnp.asarray(bv, jnp.float32), (1, -1))
        return jnp.zeros((1, PAD), jnp.float32).at[:, :bv.shape[1]].set(bv)

    w4a, w4b = params["w4"][:emb], params["w4"][emb:]    # split concat into two blocks
    wslab = jnp.concatenate(
        [padw(params["w1"]), padw(params["w2"]), padw(params["w3"]),
         padw(w4a), padw(w4b), padw(params["w5"]), padw(params["w6"])],
        axis=0).astype(jnp.bfloat16)                                   # (7*kr, PAD) bf16
    bslab = jnp.concatenate(
        [padb(params["b1"]), padb(params["b2"]), padb(params["b3"]),
         padb(params["b4"]), padb(params["b5"]), padb(params["b6"]),
         jnp.zeros((2, PAD), jnp.float32)], axis=0)                    # (8, PAD) f32
    return wslab, bslab


def invariant_embedding_forward(params, x, aisle_nrs, batch, num_segments=None):
    """Host glue (id arithmetic, padding, weight packing) + a single pallas_call."""
    aisle_nrs = np.asarray(aisle_nrs, dtype=np.int32)
    batch = np.asarray(batch, dtype=np.int32)
    assert aisle_nrs.size > 0
    # spec: aisle_ids = aisle_nrs + batch * (aisle_nrs.max() + 1)
    # (host numpy; pass host arrays — device arrays would force a blocking sync here)
    aisle_ids = aisle_nrs + batch * (int(aisle_nrs.max()) + 1)

    n, in_c = x.shape
    emb_c = params["w3"].shape[1]
    out_c = params["w6"].shape[1]
    fan_ins = (in_c, params["w2"].shape[0], params["w3"].shape[0],
               emb_c, emb_c, params["w5"].shape[0], params["w6"].shape[0])
    kr = _round_up(max(fan_ins), 16)     # uniform row count per packed weight block
    assert kr <= PAD

    n_pad = _round_up(max(n, 16), 16)    # bf16 sublane packing -> multiples of 16

    s_real = int(aisle_ids.max()) + 1
    if num_segments is None:
        # +1 spare slot absorbs the dummy segment used by padded rows (all-zero input
        # rows still produce a non-zero embedding via bias propagation); rounded to a
        # lane multiple so the kernel shape (and Mosaic compile) stays stable.
        num_segments = _round_up(s_real + 1, 128)
    # Do NOT remove the spare slot: padded rows are routed to segment `s_real`,
    # which no real node ever reads.
    assert num_segments >= s_real + 1

    ids_np = np.full((n_pad,), s_real, dtype=np.int32)   # padded rows -> dummy segment
    ids_np[:n] = aisle_ids
    ids_col = jnp.asarray(ids_np.reshape(n_pad, 1))      # for the (Np, S) one-hot
    ids_row = jnp.asarray(ids_np.reshape(1, n_pad))      # for the (S, Np) one-hot

    x_pad = (jnp.zeros((n_pad, kr), jnp.float32)
             .at[:n, :in_c].set(jnp.asarray(x, jnp.float32))
             .astype(jnp.bfloat16))
    wslab, bslab = _pack_params(params, kr)

    flops = 2 * n_pad * kr * PAD * 7 + 2 * 2 * n_pad * num_segments * kr
    bytes_accessed = (2 * (x_pad.size + wslab.size)
                      + 4 * (ids_col.size + ids_row.size + bslab.size + n_pad * PAD))

    kernel = functools.partial(_inv_mlp_embedding_kernel, n_seg=num_segments, kr=kr)
    out = pl.pallas_call(
        kernel,
        out_shape=jax.ShapeDtypeStruct((n_pad, PAD), jnp.float32),
        in_specs=[pl.BlockSpec(memory_space=pltpu.MemorySpace.VMEM)] * 5,
        out_specs=pl.BlockSpec(memory_space=pltpu.MemorySpace.VMEM),
        cost_estimate=pl.CostEstimate(flops=int(flops), transcendentals=0,
                                      bytes_accessed=int(bytes_accessed)),
    )(x_pad, ids_col, ids_row, wslab, bslab)

    return out[:n, :out_c], aisle_ids, s_real


def init_params(key, in_c, hidden_c, emb_c, hidden_after1, hidden_after2, out_c):
    """Deterministic init mirroring torch.nn.Linear shapes (weights stored [in, out])."""
    ks = jax.random.split(key, 12)

    def lin(kw, kb, fan_in, fan_out):
        bound = 1.0 / np.sqrt(fan_in)
        w = jax.random.uniform(kw, (fan_in, fan_out), jnp.float32, -bound, bound)
        b = jax.random.uniform(kb, (1, fan_out), jnp.float32, -bound, bound)
        return w, b

    w1, b1 = lin(ks[0], ks[1], in_c, hidden_c)
    w2, b2 = lin(ks[2], ks[3], hidden_c, hidden_c)
    w3, b3 = lin(ks[4], ks[5], hidden_c, emb_c)
    w4, b4 = lin(ks[6], ks[7], emb_c * 2, hidden_after1)
    w5, b5 = lin(ks[8], ks[9], hidden_after1, hidden_after2)
    w6, b6 = lin(ks[10], ks[11], hidden_after2, out_c)
    return dict(w1=w1, b1=b1, w2=w2, b2=b2, w3=w3, b3=b3,
                w4=w4, b4=b4, w5=w5, b5=b5, w6=w6, b6=b6)


def reference_forward(params, x, aisle_ids, num_segments):
    """Pure-JAX reference matching the PyTorch module (no activation on last layer)."""
    h = _lrelu(x @ params["w1"] + params["b1"])
    h = _lrelu(h @ params["w2"] + params["b2"])
    e = h @ params["w3"] + params["b3"]
    ids = jnp.asarray(aisle_ids, dtype=jnp.int32)
    seg_sum = jax.ops.segment_sum(e, ids, num_segments)
    cnt = jax.ops.segment_sum(jnp.ones((e.shape[0], 1), jnp.float32), ids, num_segments)
    seg_mean = seg_sum / jnp.maximum(cnt, 1.0)
    cat = jnp.concatenate([e, seg_mean[ids]], axis=1)
    h2 = _lrelu(cat @ params["w4"] + params["b4"])
    h2 = _lrelu(h2 @ params["w5"] + params["b5"])
    return h2 @ params["w6"] + params["b6"]


if __name__ == "__main__":
    # Small shapes implied by the forward: node features [N, in_channels],
    # per-node aisle numbers and graph batch ids [N].
    in_channels, hidden_channels, emb_channels = 8, 32, 16
    hidden_after1, hidden_after2, out_channels = 32, 32, 8
    N = 16          # total nodes across the batch
    num_graphs = 2  # values in `batch`
    num_aisles = 4  # values in `aisle_nrs`

    key = jax.random.PRNGKey(0)
    k_x, k_a, k_p = jax.random.split(key, 3)

    x = jax.random.normal(k_x, (N, in_channels), jnp.float32)
    aisle_nrs = np.asarray(jax.random.randint(k_a, (N,), 0, num_aisles), dtype=np.int32)
    batch = np.repeat(np.arange(num_graphs, dtype=np.int32), N // num_graphs)

    params = init_params(k_p, in_channels, hidden_channels, emb_channels,
                         hidden_after1, hidden_after2, out_channels)

    out, aisle_ids, s_real = invariant_embedding_forward(params, x, aisle_nrs, batch)
    out = jax.block_until_ready(out)

    ref = reference_forward(params, x, aisle_ids, s_real)
    np.testing.assert_allclose(np.asarray(out), np.asarray(ref), rtol=2e-2, atol=2e-2)

    print("KERNEL_OK")
</pallas_src>

<mosaic_0001>
module attributes {stable_mosaic.version = 11 : i64} {
  func.func @_inv_mlp_embedding_kernel(%arg0: memref<16x32xbf16, #tpu.memory_space<vmem>>, %arg1: memref<16x1xi32, #tpu.memory_space<vmem>>, %arg2: memref<1x16xi32, #tpu.memory_space<vmem>>, %arg3: memref<224x128xbf16, #tpu.memory_space<vmem>>, %arg4: memref<8x128xf32, #tpu.memory_space<vmem>>, %arg5: memref<16x128xf32, #tpu.memory_space<vmem>>) attributes {dimension_semantics = [], scalar_prefetch = 0 : i64, scratch_operands = 0 : i64, tpu.core_type = #tpu.core_type<tc>} {
    %c0 = arith.constant 0 : index
    %c0_0 = arith.constant 0 : index
    %0 = vector.load %arg0[%c0, %c0_0] : memref<16x32xbf16, #tpu.memory_space<vmem>>, vector<16x32xbf16>
    %c0_1 = arith.constant 0 : index
    %c0_2 = arith.constant 0 : index
    %1 = vector.load %arg4[%c0_1, %c0_2] : memref<8x128xf32, #tpu.memory_space<vmem>>, vector<8x128xf32>
    %c0_3 = arith.constant 0 : index
    %c0_4 = arith.constant 0 : index
    %2 = vector.load %arg3[%c0_3, %c0_4] : memref<224x128xbf16, #tpu.memory_space<vmem>>, vector<32x128xbf16>
    %cst = arith.constant dense<0.000000e+00> : vector<16x128xf32>
    %3 = tpu.matmul %0, %2, %cst {dimension_numbers = #tpu.dot_dimension_numbers<[1], [0], [0], [1], [0, 0, 1, 1], [], []>} : vector<16x32xbf16>, vector<32x128xbf16>, vector<16x128xf32> -> vector<16x128xf32>
    %4 = vector.extract_strided_slice %1 {offsets = [0, 0], sizes = [1, 128], strides = [1, 1]} : vector<8x128xf32> to vector<1x128xf32>
    %5 = vector.broadcast %4 : vector<1x128xf32> to vector<16x128xf32>
    %6 = arith.addf %3, %5 : vector<16x128xf32>
    %cst_5 = arith.constant 0.000000e+00 : f32
    %7 = vector.broadcast %cst_5 : f32 to vector<16x128xf32>
    %8 = arith.cmpf ogt, %6, %7 : vector<16x128xf32>
    %cst_6 = arith.constant 0.00999999977 : f32
    %9 = vector.broadcast %cst_6 : f32 to vector<16x128xf32>
    %10 = arith.mulf %9, %6 : vector<16x128xf32>
    %11 = arith.select %8, %6, %10 : vector<16x128xi1>, vector<16x128xf32>
    %12 = vector.extract_strided_slice %11 {offsets = [0, 0], sizes = [16, 32], strides = [1, 1]} : vector<16x128xf32> to vector<16x32xf32>
    %13 = arith.truncf %12 : vector<16x32xf32> to vector<16x32xbf16>
    %c32 = arith.constant 32 : index
    %c0_7 = arith.constant 0 : index
    %14 = vector.load %arg3[%c32, %c0_7] : memref<224x128xbf16, #tpu.memory_space<vmem>>, vector<32x128xbf16>
    %cst_8 = arith.constant dense<0.000000e+00> : vector<16x128xf32>
    %15 = tpu.matmul %13, %14, %cst_8 {dimension_numbers = #tpu.dot_dimension_numbers<[1], [0], [0], [1], [0, 0, 1, 1], [], []>} : vector<16x32xbf16>, vector<32x128xbf16>, vector<16x128xf32> -> vector<16x128xf32>
    %16 = vector.extract_strided_slice %1 {offsets = [1, 0], sizes = [1, 128], strides = [1, 1]} : vector<8x128xf32> to vector<1x128xf32>
    %17 = vector.broadcast %16 : vector<1x128xf32> to vector<16x128xf32>
    %18 = arith.addf %15, %17 : vector<16x128xf32>
    %cst_9 = arith.constant 0.000000e+00 : f32
    %19 = vector.broadcast %cst_9 : f32 to vector<16x128xf32>
    %20 = arith.cmpf ogt, %18, %19 : vector<16x128xf32>
    %cst_10 = arith.constant 0.00999999977 : f32
    %21 = vector.broadcast %cst_10 : f32 to vector<16x128xf32>
    %22 = arith.mulf %21, %18 : vector<16x128xf32>
    %23 = arith.select %20, %18, %22 : vector<16x128xi1>, vector<16x128xf32>
    %24 = vector.extract_strided_slice %23 {offsets = [0, 0], sizes = [16, 32], strides = [1, 1]} : vector<16x128xf32> to vector<16x32xf32>
    %25 = arith.truncf %24 : vector<16x32xf32> to vector<16x32xbf16>
    %c64 = arith.constant 64 : index
    %c0_11 = arith.constant 0 : index
    %26 = vector.load %arg3[%c64, %c0_11] : memref<224x128xbf16, #tpu.memory_space<vmem>>, vector<32x128xbf16>
    %cst_12 = arith.constant dense<0.000000e+00> : vector<16x128xf32>
    %27 = tpu.matmul %25, %26, %cst_12 {dimension_numbers = #tpu.dot_dimension_numbers<[1], [0], [0], [1], [0, 0, 1, 1], [], []>} : vector<16x32xbf16>, vector<32x128xbf16>, vector<16x128xf32> -> vector<16x128xf32>
    %28 = vector.extract_strided_slice %1 {offsets = [2, 0], sizes = [1, 128], strides = [1, 1]} : vector<8x128xf32> to vector<1x128xf32>
    %29 = vector.broadcast %28 : vector<1x128xf32> to vector<16x128xf32>
    %30 = arith.addf %27, %29 : vector<16x128xf32>
    %31 = vector.extract_strided_slice %30 {offsets = [0, 0], sizes = [16, 32], strides = [1, 1]} : vector<16x128xf32> to vector<16x32xf32>
    %32 = arith.truncf %31 : vector<16x32xf32> to vector<16x32xbf16>
    %c0_13 = arith.constant 0 : index
    %c0_14 = arith.constant 0 : index
    %33 = vector.load %arg1[%c0_13, %c0_14] : memref<16x1xi32, #tpu.memory_space<vmem>>, vector<16x1xi32>
    %c0_15 = arith.constant 0 : index
    %c0_16 = arith.constant 0 : index
    %34 = vector.load %arg2[%c0_15, %c0_16] : memref<1x16xi32, #tpu.memory_space<vmem>>, vector<1x16xi32>
    %35 = tpu.iota {dimensions = array<i32: 1>} : vector<16x128xi32>
    %36 = vector.broadcast %33 : vector<16x1xi32> to vector<16x128xi32>
    %37 = arith.cmpi eq, %35, %36 : vector<16x128xi32>
    %38 = arith.extui %37 : vector<16x128xi1> to vector<16x128xi32>
    %39 = arith.sitofp %38 : vector<16x128xi32> to vector<16x128xf32>
    %40 = tpu.iota {dimensions = array<i32: 0>} : vector<128x16xi32>
    %41 = vector.broadcast %34 : vector<1x16xi32> to vector<128x16xi32>
    %42 = arith.cmpi eq, %40, %41 : vector<128x16xi32>
    %43 = arith.extui %42 : vector<128x16xi1> to vector<128x16xi32>
    %44 = arith.sitofp %43 : vector<128x16xi32> to vector<128x16xf32>
    %45 = arith.truncf %44 : vector<128x16xf32> to vector<128x16xbf16>
    %cst_17 = arith.constant dense<0.000000e+00> : vector<128xf32>
    %46 = vector.multi_reduction <add>, %39, %cst_17 [0] : vector<16x128xf32> to vector<128xf32>
    %47 = vector.shape_cast %46 : vector<128xf32> to vector<1x128xf32>
    %cst_18 = arith.constant 1.000000e+00 : f32
    %48 = vector.broadcast %cst_18 : f32 to vector<1x128xf32>
    %49 = arith.maximumf %47, %48 : vector<1x128xf32>
    %cst_19 = arith.constant 1.000000e+00 : f32
    %50 = vector.broadcast %cst_19 : f32 to vector<1x128xf32>
    %51 = arith.divf %50, %49 : vector<1x128xf32>
    %cst_20 = arith.constant dense<0.000000e+00> : vector<128x32xf32>
    %52 = tpu.matmul %45, %32, %cst_20 {dimension_numbers = #tpu.dot_dimension_numbers<[1], [0], [0], [1], [0, 0, 1, 1], [], []>} : vector<128x16xbf16>, vector<16x32xbf16>, vector<128x32xf32> -> vector<128x32xf32>
    %53 = vector.broadcast %51 : vector<1x128xf32> to vector<16x128xf32>
    %54 = arith.mulf %39, %53 : vector<16x128xf32>
    %55 = arith.truncf %54 : vector<16x128xf32> to vector<16x128xbf16>
    %56 = arith.truncf %52 : vector<128x32xf32> to vector<128x32xbf16>
    %cst_21 = arith.constant dense<0.000000e+00> : vector<16x32xf32>
    %57 = tpu.matmul %55, %56, %cst_21 {dimension_numbers = #tpu.dot_dimension_numbers<[1], [0], [0], [1], [0, 0, 1, 1], [], []>} : vector<16x128xbf16>, vector<128x32xbf16>, vector<16x32xf32> -> vector<16x32xf32>
    %c96 = arith.constant 96 : index
    %c0_22 = arith.constant 0 : index
    %58 = vector.load %arg3[%c96, %c0_22] : memref<224x128xbf16, #tpu.memory_space<vmem>>, vector<32x128xbf16>
    %cst_23 = arith.constant dense<0.000000e+00> : vector<16x128xf32>
    %59 = tpu.matmul %32, %58, %cst_23 {dimension_numbers = #tpu.dot_dimension_numbers<[1], [0], [0], [1], [0, 0, 1, 1], [], []>} : vector<16x32xbf16>, vector<32x128xbf16>, vector<16x128xf32> -> vector<16x128xf32>
    %60 = arith.truncf %57 : vector<16x32xf32> to vector<16x32xbf16>
    %c128 = arith.constant 128 : index
    %c0_24 = arith.constant 0 : index
    %61 = vector.load %arg3[%c128, %c0_24] : memref<224x128xbf16, #tpu.memory_space<vmem>>, vector<32x128xbf16>
    %cst_25 = arith.constant dense<0.000000e+00> : vector<16x128xf32>
    %62 = tpu.matmul %60, %61, %cst_25 {dimension_numbers = #tpu.dot_dimension_numbers<[1], [0], [0], [1], [0, 0, 1, 1], [], []>} : vector<16x32xbf16>, vector<32x128xbf16>, vector<16x128xf32> -> vector<16x128xf32>
    %63 = arith.addf %59, %62 : vector<16x128xf32>
    %64 = vector.extract_strided_slice %1 {offsets = [3, 0], sizes = [1, 128], strides = [1, 1]} : vector<8x128xf32> to vector<1x128xf32>
    %65 = vector.broadcast %64 : vector<1x128xf32> to vector<16x128xf32>
    %66 = arith.addf %63, %65 : vector<16x128xf32>
    %cst_26 = arith.constant 0.000000e+00 : f32
    %67 = vector.broadcast %cst_26 : f32 to vector<16x128xf32>
    %68 = arith.cmpf ogt, %66, %67 : vector<16x128xf32>
    %cst_27 = arith.constant 0.00999999977 : f32
    %69 = vector.broadcast %cst_27 : f32 to vector<16x128xf32>
    %70 = arith.mulf %69, %66 : vector<16x128xf32>
    %71 = arith.select %68, %66, %70 : vector<16x128xi1>, vector<16x128xf32>
    %72 = vector.extract_strided_slice %71 {offsets = [0, 0], sizes = [16, 32], strides = [1, 1]} : vector<16x128xf32> to vector<16x32xf32>
    %73 = arith.truncf %72 : vector<16x32xf32> to vector<16x32xbf16>
    %c160 = arith.constant 160 : index
    %c0_28 = arith.constant 0 : index
    %74 = vector.load %arg3[%c160, %c0_28] : memref<224x128xbf16, #tpu.memory_space<vmem>>, vector<32x128xbf16>
    %cst_29 = arith.constant dense<0.000000e+00> : vector<16x128xf32>
    %75 = tpu.matmul %73, %74, %cst_29 {dimension_numbers = #tpu.dot_dimension_numbers<[1], [0], [0], [1], [0, 0, 1, 1], [], []>} : vector<16x32xbf16>, vector<32x128xbf16>, vector<16x128xf32> -> vector<16x128xf32>
    %76 = vector.extract_strided_slice %1 {offsets = [4, 0], sizes = [1, 128], strides = [1, 1]} : vector<8x128xf32> to vector<1x128xf32>
    %77 = vector.broadcast %76 : vector<1x128xf32> to vector<16x128xf32>
    %78 = arith.addf %75, %77 : vector<16x128xf32>
    %cst_30 = arith.constant 0.000000e+00 : f32
    %79 = vector.broadcast %cst_30 : f32 to vector<16x128xf32>
    %80 = arith.cmpf ogt, %78, %79 : vector<16x128xf32>
    %cst_31 = arith.constant 0.00999999977 : f32
    %81 = vector.broadcast %cst_31 : f32 to vector<16x128xf32>
    %82 = arith.mulf %81, %78 : vector<16x128xf32>
    %83 = arith.select %80, %78, %82 : vector<16x128xi1>, vector<16x128xf32>
    %84 = vector.extract_strided_slice %83 {offsets = [0, 0], sizes = [16, 32], strides = [1, 1]} : vector<16x128xf32> to vector<16x32xf32>
    %85 = arith.truncf %84 : vector<16x32xf32> to vector<16x32xbf16>
    %c192 = arith.constant 192 : index
    %c0_32 = arith.constant 0 : index
    %86 = vector.load %arg3[%c192, %c0_32] : memref<224x128xbf16, #tpu.memory_space<vmem>>, vector<32x128xbf16>
    %cst_33 = arith.constant dense<0.000000e+00> : vector<16x128xf32>
    %87 = tpu.matmul %85, %86, %cst_33 {dimension_numbers = #tpu.dot_dimension_numbers<[1], [0], [0], [1], [0, 0, 1, 1], [], []>} : vector<16x32xbf16>, vector<32x128xbf16>, vector<16x128xf32> -> vector<16x128xf32>
    %88 = vector.extract_strided_slice %1 {offsets = [5, 0], sizes = [1, 128], strides = [1, 1]} : vector<8x128xf32> to vector<1x128xf32>
    %89 = vector.broadcast %88 : vector<1x128xf32> to vector<16x128xf32>
    %90 = arith.addf %87, %89 : vector<16x128xf32>
    %c0_34 = arith.constant 0 : index
    %c0_35 = arith.constant 0 : index
    %91 = vector.load %arg5[%c0_34, %c0_35] : memref<16x128xf32, #tpu.memory_space<vmem>>, vector<16x128xf32>
    tpu.vector_store %arg5[%c0_34, %c0_35], %90 {strides = array<i32>} : memref<16x128xf32, #tpu.memory_space<vmem>>, vector<16x128xf32>,
    return
  }
}

</mosaic_0001>

<bundles_post_ra>
// kernel: tpu_custom_call.1
= control target key start
LH: loop header
LB: loop body
LE: loop exit
PB: predicated region body
PF: predicated region fallthrough
CT: control target
= control target key end

     0   :  { %10 = vsyncpa [#allocation3], 0  ;;  %s1281_s0 = inlined_call_operand.vmem [shape: bf16[16,32], index: 0, kind: input, shape index: {}]   ;;  %s1282_s1 = inlined_call_operand.vmem [shape: s32[16,1], index: 1, kind: input, shape index: {}]   ;;  %s1283_s2 = inlined_call_operand.vmem [shape: s32[1,16], index: 2, kind: input, shape index: {}]   ;;  %s1284_s3 = inlined_call_operand.hbm [shape: bf16[224,128], index: 3, kind: input, shape index: {}]   ;;  %s1285_s4 = inlined_call_operand.vmem [shape: f32[8,128], index: 4, kind: input, shape index: {}]   ;;  %s1286_s5 = inlined_call_operand.hbm [shape: f32[16,128], index: 5, kind: output, shape index: {}]  }
   0x1   :  { %11 = vsyncpa [#allocation4], 0  ;;  %s1075_s18 = smov [#allocation2]   ;;  %s1027_s22 = scalar_lea.hbm %s1284_s3, 1792 }
   0x2   :  { %s23_s19 = sshll.u32 %s1075_s18, 4  ;;  %p1028_p0 = scmp.ne.s32.totalorder %s1284_s3, %s1027_s22  ;;  %s24_s19 = int_to_ptr.vmem [resolvable:$true] %s23_s19 }
   0x3   :  { %p1031_p1 = scmp.lt.u32.totalorder %s1027_s22, %s1284_s3 }
   0x5   :  { %p1033_p2 = pnand %p1031_p1, %p1028_p0 }
   0x7   :  { %1036 = shalt.err (!%p1033_p2)
}
   0x8   :  { %s1037_s27 = scalar_lea.vmem %s24_s19, 1792  ;;  %p1042_p4 = scmp.lt.s32.totalorder %s24_s19, %s24_s19 }
   0x9   :  { %p1038_p3 = scmp.ne.s32.totalorder %s24_s19, %s1037_s27  ;;  %p1043_p5 = scmp.lt.s32.totalorder %s1037_s27, %s1037_s27 }
   0xb   :  { %p1044_p6 = por %p1043_p5, %p1042_p4 }
   0xd   :  { %p1045_p7 = pnand %p1044_p6, %p1038_p3 }
   0xf   :  { %1048 = shalt.err (!%p1045_p7)
}
  0x10   :  { %s1076_s28 = smov 64   ;;  %s1077_s29 = smov 4  }
  0x11   :  { %29 = dma.hbm_to_vmem [thread:$0]  %s1284_s3, 1792, %s24_s19, [#allocation3], %s1076_s28, %s1076_s28, %s1077_s29  }
  0x12   :  { %1071 = dma.done.wait [#allocation3], 1792  }
  0x13   :  { %1072 = vsyncadd [#allocation3], 4294965504  ;;  %v1078_v0 = vmov 0.0   ;;  %vm1079_vm0 = vmmov 0   ;;  %v1010_v1 = vld [vmem:[#allocation2] sm:$0xff]   ;;  %v1011_v2 = vld [vmem:[#allocation2 + $0x8] sm:$0xff]   ;;  %v43_v6 = vlaneseq }
  0x14   :  { %906 = vmatprep.subr.bf16.mxu0 %v1078_v0  ;;  %910 = vmatprep.mubr.msk.bf16.mxu0 %vm1079_vm0, %v1078_v0  ;;  %v1012_v3 = vld [vmem:[%s1281_s0] sm:$0xff]   ;;  %vm64_vm1 = vcmask 261120   ;;  %v1013_v4 = vld [vmem:[#allocation2 + $0x10] sm:$0xff]   ;;  %v1014_v5 = vld [vmem:[#allocation2 + $0x18] sm:$0xff]   ;;  %vm356_vm8 = vcmask 130048   ;;  %v1080_v43 = vmov 0  }
  0x15   :  { %914 = vmatprep.subr.bf16.mxu1 %v1078_v0  ;;  %918 = vmatprep.mubr.msk.bf16.mxu1 %vm1079_vm0, %v1078_v0  ;;  %v1142_v7 = vshrl.u32 %v43_v6, 7  ;;  %v1148_v9 = vld [vmem:[%s1285_s4] sm:$0xff]  ;;  %v1016_v23 = vld [vmem:[#allocation2 + $0x28] sm:$0xff]  }
  0x16   :  { %907 = vmatpush3.bf16.msra.mxu0 %v1010_v1  ;;  %915 = vmatpush3.bf16.msra.mxu1 %v1013_v4  ;;  %v1015_v22 = vld [vmem:[#allocation2 + $0x20] sm:$0xff]   ;;  %v253_v44 = vld [vmem:[%s1282_s1 + $0x8] sm:$0xff] }
  0x17   :  { %908 = vmatprep.subr.bf16.mxu0 %v1078_v0  ;;  %916 = vmatprep.subr.bf16.mxu1 %v1078_v0  ;;  %v45_v8 = vsub.s32 0, %v1142_v7  ;;  %v122_v24 = vsub.s32 1, %v1142_v7  ;;  %v271_v37 = vadd.s32 8, %v1142_v7  ;;  %v1163_v38 = vld [vmem:[%s1283_s2] ss:$0 sm:$0xff]  ;;  %v193_v45 = vsub.s32 2, %v1142_v7 }
  0x18   :  { %vm290_vm6 = vcmp.eq.s32.totalorder %v1142_v7, %v1163_v38  ;;  %v252_v42 = vld [vmem:[%s1282_s1] sm:$0xff]  ;;  %1009 = vset.pattern.permute.xlu0 %v1080_v43  ;;  %v272_v46 = vadd.s32 16, %v1142_v7  ;;  %v273_v47 = vadd.s32 24, %v1142_v7  ;;  %v274_v48 = vadd.s32 32, %v1142_v7  ;;  %s1081_s1 = smov [#allocation5]  }
  0x19   :  { %v46_v10 = vrot.slane %v1148_v9, %v45_v8  ;;  %v123_v25 = vrot.slane %v1148_v9, %v122_v24  ;;  %vm291_vm7 = vcmp.eq.s32.totalorder %v271_v37, %v1163_v38  ;;  %v831_v39 = vsel %vm290_vm6, 1.0, %v1078_v0  ;;  %258 = vperm.xlu0 %1009, %v252_v42   ;;  %s806_s13 = sshll.u32 %s1081_s1, 4  ;;  %s807_s13 = int_to_ptr.vmem [resolvable:$true] %s806_s13 }
  0x1a   :  { %909 = vmatpush3.bf16.msra.mxu0 %v1011_v2  ;;  %917 = vmatpush3.bf16.msra.mxu1 %v1014_v5  ;;  %v832_v40 = vsel %vm291_vm7, 1.0, %v1078_v0  ;;  %v275_v49 = vadd.s32 40, %v1142_v7  ;;  %v194_v50 = vrot.slane %v1148_v9, %v193_v45  ;;  %vm292_vm9 = vcmp.eq.s32.totalorder %v272_v46, %v1163_v38  ;;  %s1049_s14 = scalar_lea.vmem %s807_s13, 256  ;;  %p1054_p9 = scmp.lt.s32.totalorder %s807_s13, %s807_s13 }
  0x1b   :  { %922 = vmatprep.subr.bf16.mxu0 %v1078_v0  ;;  %v338_v41 = vpack.c.bf16 %v832_v40, %v831_v39  ;;  %vm293_vm10 = vcmp.eq.s32.totalorder %v273_v47, %v1163_v38  ;;  %vm294_vm11 = vcmp.eq.s32.totalorder %v274_v48, %v1163_v38  ;;  %v833_v57 = vsel %vm292_vm9, 1.0, %v1078_v0  ;;  %p1050_p8 = scmp.ne.s32.totalorder %s807_s13, %s1049_s14  ;;  %p1055_p10 = scmp.lt.s32.totalorder %s1049_s14, %s1049_s14 }
  0x1c   :  { %vm295_vm12 = vcmp.eq.s32.totalorder %v275_v49, %v1163_v38  ;;  %v834_v58 = vsel %vm293_vm10, 1.0, %v1078_v0  ;;  %v276_v59 = vadd.s32 48, %v1142_v7  ;;  %v835_v61 = vsel %vm294_vm11, 1.0, %v1078_v0 }
  0x1d   :  { %911 = vmatmul.mubr.msk.bf16.vlgmr.msra.gmra.mrb[0].mxu0 %vm64_vm1, %v1012_v3  ;;  %261 = vperm.xlu0 %1009, %v253_v44   ;;  %v836_v62 = vsel %vm295_vm12, 1.0, %v1078_v0  ;;  %v277_v63 = vadd.s32 56, %v1142_v7  ;;  %v278_v1 = vadd.s32 64, %v1142_v7  ;;  %v279_v2 = vadd.s32 72, %v1142_v7  ;;  %p1056_p11 = por %p1055_p10, %p1054_p9 }
  0x1e   :  { %926 = vmatprep.mubr.msk.bf16.mxu0 %vm1079_vm0, %v1078_v0  ;;  %923 = vmatpush3.bf16.msra.mxu0 %v1015_v22  ;;  %v339_v3 = vpack.c.bf16 %v834_v58, %v833_v57  ;;  %v340_v4 = vpack.c.bf16 %v836_v62, %v835_v61  ;;  %vm296_vm13 = vcmp.eq.s32.totalorder %v276_v59, %v1163_v38  ;;  %v284_v22 = vadd.s32 112, %v1142_v7 }
  0x1f   :  { %924 = vmatprep.subr.bf16.mxu0 %v1078_v0  ;;  %vm297_vm14 = vcmp.eq.s32.totalorder %v277_v63, %v1163_v38  ;;  %vm298_vm15 = vcmp.eq.s32.totalorder %v278_v1, %v1163_v38  ;;  %v837_v5 = vsel %vm296_vm13, 1.0, %v1078_v0  ;;  %p1057_p12 = pnand %p1056_p11, %p1050_p8 }
  0x20   :  { %v838_v8 = vsel %vm297_vm14, 1.0, %v1078_v0  ;;  %vm304_vm7 = vcmp.eq.s32.totalorder %v284_v22, %v1163_v38 }
  0x22   :  { %925 = vmatpush3.bf16.msra.mxu0 %v1016_v23  ;;  %v285_v23 = vadd.s32 120, %v1142_v7 }
  0x23   :  { %948 = vmatprep.subr.bf16.mxu0 %v1078_v0 }
  0x24   :  { %vm305_vm9 = vcmp.eq.s32.totalorder %v285_v23, %v1163_v38  ;;  %v1021_v23 = vld [vmem:[#allocation2 + $0x50] sm:$0xff]  }
  0xf0   :  { %v102_v11 = vpop.f32.mrb[0].mxu0 }
  0xf1   :  { %v103_v12 = vadd.f32 %v102_v11, %v46_v10  ;;  %v912_v13 = vpop.f32.mrb[1].mxu0 }
  0xf2   :  { %v105_v14 = vpop.f32.mrb[2].mxu0  ;;  %v281_v13 = vadd.s32 88, %v1142_v7 }
  0xf3   :  { %v111_v15 = vmul.f32 0.01, %v103_v12  ;;  %v106_v16 = vadd.f32 %v105_v14, %v46_v10  ;;  %v913_v17 = vpop.f32.mrb[3].mxu0  ;;  %vm109_vm2 = vcmp.gt.f32.partialorder %v103_v12, 0.0  ;;  %v839_v10 = vsel %vm298_vm15, 1.0, %v1078_v0 }
  0xf4   :  { %v282_v14 = vadd.s32 96, %v1142_v7 }
  0xf5   :  { %vm110_vm3 = vcmp.gt.f32.partialorder %v106_v16, 0.0  ;;  %v112_v18 = vmul.f32 0.01, %v106_v16  ;;  %v113_v19 = vsel %vm109_vm2, %v103_v12, %v111_v15  ;;  %vm299_vm2 = vcmp.eq.s32.totalorder %v279_v2, %v1163_v38 }
  0xf6   :  { %v840_v11 = vsel %vm299_vm2, 1.0, %v1078_v0  ;;  %v280_v12 = vadd.s32 80, %v1142_v7  ;;  %v283_v15 = vadd.s32 104, %v1142_v7 }
  0xf7   :  { %v114_v20 = vsel %vm110_vm3, %v106_v16, %v112_v18  ;;  %v341_v16 = vpack.c.bf16 %v838_v8, %v837_v5  ;;  %v342_v17 = vpack.c.bf16 %v840_v11, %v839_v10  ;;  %v1017_v11 = vld [vmem:[#allocation2 + $0x30] sm:$0xff]  }
  0xf8   :  { %v115_v21 = vpack.c.bf16 %v114_v20, %v113_v19  ;;  %vm300_vm3 = vcmp.eq.s32.totalorder %v280_v12, %v1163_v38  ;;  %vm303_vm6 = vcmp.eq.s32.totalorder %v283_v15, %v1163_v38 }
  0xf9   :  { %v841_v18 = vsel %vm300_vm3, 1.0, %v1078_v0 }
  0xfa   :  { %919 = vmatmul.mubr.msk.bf16.vlgmr.msra.gmra.mrb[0].mxu1 %vm64_vm1, %v115_v21  ;;  %v844_v21 = vsel %vm303_vm6, 1.0, %v1078_v0 }
  0xfb   :  { %932 = vmatprep.mubr.msk.bf16.mxu1 %vm356_vm8, %v338_v41 }
 0x1cd   :  { %v173_v26 = vpop.f32.mrb[0].mxu1 }
 0x1ce   :  { %v174_v27 = vadd.f32 %v173_v26, %v123_v25  ;;  %v920_v28 = vpop.f32.mrb[1].mxu1  ;;  %v845_v26 = vsel %vm304_vm7, 1.0, %v1078_v0 }
 0x1cf   :  { %v176_v29 = vpop.f32.mrb[2].mxu1 }
 0x1d0   :  { %v182_v30 = vmul.f32 0.01, %v174_v27  ;;  %v177_v31 = vadd.f32 %v176_v29, %v123_v25  ;;  %v921_v32 = vpop.f32.mrb[3].mxu1  ;;  %vm180_vm4 = vcmp.gt.f32.partialorder %v174_v27, 0.0  ;;  %v1019_v29 = vld [vmem:[#allocation2 + $0x40] sm:$0xff]  }
 0x1d1   :  { %v256_v32 = vand.u32 127, %v43_v6 }
 0x1d2   :  { %vm181_vm5 = vcmp.gt.f32.partialorder %v177_v31, 0.0  ;;  %v183_v33 = vmul.f32 0.01, %v177_v31  ;;  %v184_v34 = vsel %vm180_vm4, %v174_v27, %v182_v30  ;;  %vm301_vm4 = vcmp.eq.s32.totalorder %v281_v13, %v1163_v38  ;;  %v1020_v30 = vld [vmem:[#allocation2 + $0x48] sm:$0xff]   ;;  %v1018_v13 = vld [vmem:[#allocation2 + $0x38] sm:$0xff]  }
 0x1d3   :  { %v842_v19 = vsel %vm301_vm4, 1.0, %v1078_v0  ;;  %v846_v27 = vsel %vm305_vm9, 1.0, %v1078_v0 }
 0x1d4   :  { %v185_v35 = vsel %vm181_vm5, %v177_v31, %v183_v33  ;;  %vm302_vm5 = vcmp.eq.s32.totalorder %v282_v14, %v1163_v38  ;;  %v343_v24 = vpack.c.bf16 %v842_v19, %v841_v18  ;;  %v345_v28 = vpack.c.bf16 %v846_v27, %v845_v26  ;;  %v259_v31 = vpop.permute.xlu0 %258 }
 0x1d5   :  { %v186_v36 = vpack.c.bf16 %v185_v35, %v184_v34  ;;  %v843_v20 = vsel %vm302_vm5, 1.0, %v1078_v0  ;;  %vm263_vm10 = vcmp.eq.s32.totalorder %v256_v32, %v259_v31 }
 0x1d6   :  { %v344_v25 = vpack.c.bf16 %v844_v21, %v843_v20  ;;  %v828_v34 = vsel %vm263_vm10, 1.0, %v1078_v0 }
 0x1d7   :  { %927 = vmatmul.mubr.msk.bf16.vlgmr.msra.gmra.mrb[4].mxu0 %vm64_vm1, %v186_v36 }
 0x1d8   :  { %964 = vmatprep.mubr.msk.bf16.mxu0 %vm1079_vm0, %v1078_v0  ;;  %v262_v33 = vpop.permute.xlu0 %261 }
 0x1d9   :  { %vm264_vm11 = vcmp.eq.s32.totalorder %v256_v32, %v262_v33 }
 0x1da   :  { %v829_v35 = vsel %vm264_vm11, 1.0, %v1078_v0 }
 0x1db   :  { %v346_v36 = vadd.f32 %v829_v35, %v828_v34 }
 0x1dd   :  { %v347_v37 = vrot.slane %v346_v36, 4 }
 0x1df   :  { %v348_v38 = vadd.f32 %v347_v37, %v346_v36 }
 0x1e1   :  { %v349_v39 = vrot.slane %v348_v38, 2 }
 0x1e3   :  { %v350_v42 = vadd.f32 %v349_v39, %v348_v38  ;;  %v1023_v39 = vld [vmem:[#allocation2 + $0x60] sm:$0xff]  }
 0x1e5   :  { %v351_v47 = vrot.slane %v350_v42, 1 }
 0x1e7   :  { %v352_v49 = vadd.f32 %v351_v47, %v350_v42 }
 0x2aa   :  { %v244_v51 = vpop.f32.mrb[4].mxu0 }
 0x2ab   :  { %v928_v52 = vpop.f32.mrb[5].mxu0  ;;  %v245_v54 = vadd.f32 %v244_v51, %v194_v50 }
 0x2ac   :  { %v247_v53 = vpop.f32.mrb[6].mxu0 }
 0x2ad   :  { %v248_v55 = vadd.f32 %v247_v53, %v194_v50  ;;  %v929_v56 = vpop.f32.mrb[7].mxu0 }
 0x2af   :  { %v1190_v60 = vpack.c.bf16 %v248_v55, %v245_v54  ;;  %v353_v54 = vmax.f32 %v352_v49, 1.0 }
 0x2b1   :  { %930 = vmatprep.subr.bf16.mxu1 %v1190_v60  ;;  %1025 = vrcp.f32 %v353_v54 }
 0x2b2   :  { %931 = vmatpush3.bf16.msra.mxu1 %v1190_v60 }
 0x2b3   :  { %968 = vmatprep.subr.bf16.mxu1 %v1078_v0 }
 0x2b5   :  { %933 = vmatmul.mubr.msk.bf16.vlgmr.msra.gmra.mrb[4].mxu1 %vm356_vm8, %v339_v3 }
 0x2b6   :  { %936 = vmatprep.mubr.msk.bf16.mxu1 %vm356_vm8, %v340_v4  ;;  %969 = vmatpush3.bf16.msra.mxu1 %v1019_v29 }
 0x2b7   :  { %970 = vmatprep.subr.bf16.mxu1 %v1078_v0 }
 0x2ba   :  { %971 = vmatpush3.bf16.msra.mxu1 %v1020_v30 }
 0x2bb   :  { %984 = vmatprep.subr.bf16.mxu1 %v1078_v0  ;;  %v1026_v4 = vpop.eup %1025 }
 0x2bc   :  { %v478_v8 = vmul.f32 %v1026_v4, %v828_v34  ;;  %v479_v10 = vmul.f32 %v1026_v4, %v829_v35 }
 0x2bd   :  { %937 = vmatmul.mubr.msk.bf16.gmra.mrb[8].mxu1 %vm356_vm8, %v341_v16 }
 0x2be   :  { %940 = vmatprep.mubr.msk.bf16.mxu1 %vm356_vm8, %v342_v17  ;;  %v480_v12 = vpack.c.bf16 %v479_v10, %v478_v8 }
 0x2c5   :  { %941 = vmatmul.mubr.msk.bf16.gmra.mrb[12].mxu1 %vm356_vm8, %v343_v24  ;;  %v653_v24 = vsub.s32 3, %v1142_v7 }
 0x2c6   :  { %944 = vmatprep.mubr.msk.bf16.mxu1 %vm356_vm8, %v344_v25 }
 0x2c7   :  { %v654_v25 = vrot.slane %v1148_v9, %v653_v24 }
 0x2cd   :  { %945 = vmatmul.mubr.msk.bf16.gmra.mrb[16].mxu1 %vm356_vm8, %v345_v28 }
 0x2ce   :  { %972 = vmatprep.mubr.msk.bf16.mxu1 %vm1079_vm0, %v1078_v0 }
 0x388   :  { %v934_v40 = vpop.f32.mrb[4].mxu1 }
 0x389   :  { %v415_v41 = vpop.f32.mrb[5].mxu1 }
 0x38a   :  { %v935_v43 = vpop.f32.mrb[6].mxu1 }
 0x38b   :  { %v482_v44 = vpack.c.bf16 %v935_v43, %v934_v40  ;;  %v418_v45 = vpop.f32.mrb[7].mxu1  ;;  %v1024_v40 = vld [vmem:[#allocation2 + $0x68] sm:$0xff]  }
 0x38c   :  { %v481_v46 = vpack.c.bf16 %v418_v45, %v415_v41  ;;  %v670_v41 = vsub.s32 4, %v1142_v7 }
 0x38e   :  { %949 = vmatpush3.bf16.msra.mxu0 %v481_v46  ;;  %v671_v42 = vrot.slane %v1148_v9, %v670_v41 }
 0x38f   :  { %950 = vmatprep.subr.bf16.mxu0 %v1078_v0 }
 0x390   :  { %v938_v6 = vpop.f32.mrb[8].mxu1 }
 0x391   :  { %v431_v48 = vpop.f32.mrb[9].mxu1 }
 0x392   :  { %v939_v50 = vpop.f32.mrb[10].mxu1  ;;  %951 = vmatpush3.bf16.msra.mxu0 %v482_v44 }
 0x393   :  { %v484_v51 = vpack.c.bf16 %v939_v50, %v938_v6  ;;  %v434_v52 = vpop.f32.mrb[11].mxu1  ;;  %952 = vmatprep.subr.bf16.mxu0 %v1078_v0 }
 0x394   :  { %v483_v53 = vpack.c.bf16 %v434_v52, %v431_v48 }
 0x396   :  { %953 = vmatpush3.bf16.msra.mxu0 %v483_v53 }
 0x397   :  { %954 = vmatprep.subr.bf16.mxu0 %v1078_v0 }
 0x398   :  { %v942_v55 = vpop.f32.mrb[12].mxu1 }
 0x399   :  { %v447_v56 = vpop.f32.mrb[13].mxu1 }
 0x39a   :  { %v943_v57 = vpop.f32.mrb[14].mxu1  ;;  %955 = vmatpush3.bf16.msra.mxu0 %v484_v51 }
 0x39b   :  { %v486_v58 = vpack.c.bf16 %v943_v57, %v942_v55  ;;  %v450_v59 = vpop.f32.mrb[15].mxu1  ;;  %956 = vmatprep.subr.bf16.mxu0 %v1078_v0 }
 0x39c   :  { %v485_v61 = vpack.c.bf16 %v450_v59, %v447_v56 }
 0x39e   :  { %957 = vmatpush3.bf16.msra.mxu0 %v485_v61 }
 0x39f   :  { %958 = vmatprep.subr.bf16.mxu0 %v1078_v0 }
 0x3a0   :  { %v946_v62 = vpop.f32.mrb[16].mxu1 }
 0x3a1   :  { %v463_v63 = vpop.f32.mrb[17].mxu1 }
 0x3a2   :  { %v947_v1 = vpop.f32.mrb[18].mxu1  ;;  %959 = vmatpush3.bf16.msra.mxu0 %v486_v58 }
 0x3a3   :  { %v488_v2 = vpack.c.bf16 %v947_v1, %v946_v62  ;;  %v466_v3 = vpop.f32.mrb[19].mxu1  ;;  %960 = vmatprep.subr.bf16.mxu0 %v1078_v0 }
 0x3a4   :  { %v487_v5 = vpack.c.bf16 %v466_v3, %v463_v63 }
 0x3a6   :  { %961 = vmatpush3.bf16.msra.mxu0 %v487_v5 }
 0x3a7   :  { %962 = vmatprep.subr.bf16.mxu0 %v1078_v0 }
 0x3aa   :  { %963 = vmatpush3.bf16.msra.mxu0 %v488_v2 }
 0x3ab   :  { %976 = vmatprep.subr.bf16.mxu0 %v1078_v0 }
 0x3ad   :  { %965 = vmatmul.mubr.bf16.vlgmr.msra.gmra.mrb[8].mxu0 %v480_v12 }
 0x3ae   :  { %977 = vmatpush3.bf16.msra.mxu0 %v1017_v11  ;;  %980 = vmatprep.mubr.msk.bf16.mxu0 %vm1079_vm0, %v1078_v0 }
 0x3af   :  { %978 = vmatprep.subr.bf16.mxu0 %v1078_v0 }
 0x3b2   :  { %979 = vmatpush3.bf16.msra.mxu0 %v1018_v13 }
 0x3b3   :  { %992 = vmatprep.subr.bf16.mxu0 %v1078_v0 }
 0x3b5   :  { %981 = vmatmul.mubr.msk.bf16.vlgmr.msra.gmra.mrb[12].mxu0 %vm64_vm1, %v1190_v60  ;;  %v1022_v60 = vld [vmem:[#allocation2 + $0x58] sm:$0xff]  }
 0x3b6   :  { %996 = vmatprep.mubr.msk.bf16.mxu0 %vm1079_vm0, %v1078_v0  ;;  %993 = vmatpush3.bf16.msra.mxu0 %v1023_v39 }
 0x3b7   :  { %994 = vmatprep.subr.bf16.mxu0 %v1078_v0 }
 0x3ba   :  { %995 = vmatpush3.bf16.msra.mxu0 %v1024_v40 }
 0x480   :  { %v523_v14 = vpop.f32.mrb[8].mxu0 }
 0x481   :  { %v966_v15 = vpop.f32.mrb[9].mxu0 }
 0x482   :  { %v526_v16 = vpop.f32.mrb[10].mxu0 }
 0x483   :  { %v534_v17 = vpack.c.bf16 %v526_v16, %v523_v14  ;;  %v967_v18 = vpop.f32.mrb[11].mxu0 }
 0x485   :  { %973 = vmatmul.mubr.msk.bf16.vlgmr.msra.gmra.mrb[20].mxu1 %vm64_vm1, %v534_v17 }
 0x486   :  { %988 = vmatprep.mubr.msk.bf16.mxu1 %vm1079_vm0, %v1078_v0  ;;  %985 = vmatpush3.bf16.msra.mxu1 %v1021_v23 }
 0x487   :  { %986 = vmatprep.subr.bf16.mxu1 %v1078_v0  ;;  %v741_v0 = vsub.s32 5, %v1142_v7 }
 0x488   :  { %v644_v19 = vpop.f32.mrb[12].mxu0 }
 0x489   :  { %v982_v20 = vpop.f32.mrb[13].mxu0  ;;  %v742_v53 = vrot.slane %v1148_v9, %v741_v0 }
 0x48a   :  { %v647_v21 = vpop.f32.mrb[14].mxu0  ;;  %987 = vmatpush3.bf16.msra.mxu1 %v1022_v60 }
 0x48b   :  { %v983_v22 = vpop.f32.mrb[15].mxu0 }
 0x558   :  { %v588_v26 = vpop.f32.mrb[20].mxu1 }
 0x559   :  { %v645_v27 = vadd.f32 %v644_v19, %v588_v26  ;;  %v974_v28 = vpop.f32.mrb[21].mxu1 }
 0x55a   :  { %v591_v29 = vpop.f32.mrb[22].mxu1 }
 0x55b   :  { %v655_v30 = vadd.f32 %v654_v25, %v645_v27  ;;  %v648_v31 = vadd.f32 %v647_v21, %v591_v29  ;;  %v975_v32 = vpop.f32.mrb[23].mxu1 }
 0x55d   :  { %v659_v33 = vmul.f32 0.01, %v655_v30  ;;  %v656_v34 = vadd.f32 %v654_v25, %v648_v31  ;;  %vm657_vm0 = vcmp.gt.f32.partialorder %v655_v30, 0.0 }
 0x55f   :  { %vm658_vm8 = vcmp.gt.f32.partialorder %v656_v34, 0.0  ;;  %v660_v35 = vmul.f32 0.01, %v656_v34  ;;  %v661_v36 = vsel %vm657_vm0, %v655_v30, %v659_v33 }
 0x561   :  { %v662_v37 = vsel %vm658_vm8, %v656_v34, %v660_v35 }
 0x562   :  { %v663_v38 = vpack.c.bf16 %v662_v37, %v661_v36 }
 0x564   :  { %989 = vmatmul.mubr.msk.bf16.vlgmr.msra.gmra.mrb[24].mxu1 %vm64_vm1, %v663_v38 }
 0x637   :  { %v721_v43 = vpop.f32.mrb[24].mxu1 }
 0x638   :  { %v722_v44 = vadd.f32 %v721_v43, %v671_v42  ;;  %v990_v45 = vpop.f32.mrb[25].mxu1 }
 0x639   :  { %v724_v46 = vpop.f32.mrb[26].mxu1 }
 0x63a   :  { %v730_v47 = vmul.f32 0.01, %v722_v44  ;;  %v725_v6 = vadd.f32 %v724_v46, %v671_v42  ;;  %v991_v48 = vpop.f32.mrb[27].mxu1  ;;  %vm728_vm12 = vcmp.gt.f32.partialorder %v722_v44, 0.0 }
 0x63c   :  { %vm729_vm13 = vcmp.gt.f32.partialorder %v725_v6, 0.0  ;;  %v731_v49 = vmul.f32 0.01, %v725_v6  ;;  %v732_v50 = vsel %vm728_vm12, %v722_v44, %v730_v47 }
 0x63e   :  { %v733_v51 = vsel %vm729_vm13, %v725_v6, %v731_v49 }
 0x63f   :  { %v734_v52 = vpack.c.bf16 %v733_v51, %v732_v50 }
 0x641   :  { %997 = vmatmul.mubr.msk.bf16.vlgmr.msra.gmra.mrb[16].mxu0 %vm64_vm1, %v734_v52 }
 0x714   :  { %v792_v54 = vpop.f32.mrb[16].mxu0 }
 0x715   :  { %v793_v55 = vadd.f32 %v792_v54, %v742_v53  ;;  %v998_v56 = vpop.f32.mrb[17].mxu0 }
 0x716   :  { %v795_v57 = vpop.f32.mrb[18].mxu0 }
 0x717   :  { %799 = vst [vmem:[#allocation5] sm:$0xff] %v793_v55  ;;  %v796_v58 = vadd.f32 %v795_v57, %v742_v53  ;;  %v999_v59 = vpop.f32.mrb[19].mxu0 }
 0x719   :  { %800 = vst [vmem:[#allocation5 + $0x8] sm:$0xff] %v796_v58 }
 0x71a   :  { %1060 = shalt.err (!%p1057_p12)
}
 0x71b   :  { %s1061_s17 = scalar_lea.hbm %s1286_s5, 256 }
 0x71c   :  { %p1062_p13 = scmp.ne.s32.totalorder %s1286_s5, %s1061_s17  ;;  %p1065_p0 = scmp.lt.u32.totalorder %s1061_s17, %s1286_s5 }
 0x71e   :  { %p1067_p1 = pnand %p1065_p0, %p1062_p13 }
 0x720   :  { %1070 = shalt.err (!%p1067_p1)
}
 0x721   :  { %s1082_s22 = smov 128   ;;  %s1083_s23 = smov 8  }
 0x722   :  { %812 = dma.vmem_to_hbm [thread:$0]  %s807_s13, 256, %s1286_s5, [#allocation4], %s1082_s22, %s1082_s22, %s1083_s23  }
 0x723   :  { %1073 = dma.done.wait [#allocation4], 256  }
 0x724   :  { %1074 = vsyncadd [#allocation4], 4294967040 }
 0x725   :  { %816 = vsyncpa [#allocation3], 1 }
 0x726   :  { %817 = vsyncpa [#allocation4], 1 }

</bundles_post_ra>
